<compile_context>
chip_gen: v5e
topology: v5e:2x2
jax: 0.10.0
libtpu: 0.0.40
codegen_flags: <defaults>
</compile_context>

<pallas_src>
from typing import NamedTuple

import jax
import jax.numpy as jnp
from jax.experimental import pallas as pl
from jax.experimental.pallas import tpu as pltpu

HIDDEN = 128          # fc1 / fc2 width
LANE = 128            # TPU lane width; fc3 output padded to this for lane-dense stores
FEAT_PAD = 8          # n_states (4) padded up to one f32 sublane (enables MXU fc1)
MULTI_TC_BATCH = 256  # batches >= this get >=2 tiles so v7x's 2 TCs both work
MXU_DTYPE = jnp.bfloat16  # operand dtype for the 128x128 MXU matmuls (f32 accum)


def _cdiv(a, b):
    return (a + b - 1) // b


def _round_up(n, m):
    return ((n + m - 1) // m) * m


def _select_tile(batch, tm_max):
    """Tile-count-first selection: minimal padding, >=2 tiles for big batches."""
    n_tiles = _cdiv(batch, tm_max)
    if batch >= MULTI_TC_BATCH:
        n_tiles = max(n_tiles, 2)          # shard across both TensorCores on v7x
    tm = _round_up(_cdiv(batch, n_tiles), 8)
    return tm, n_tiles * tm, n_tiles


class PreparedParams(NamedTuple):
    w1: jax.Array       # (FEAT_PAD, HIDDEN) f32, feature-padded
    b1: jax.Array       # (1, HIDDEN) f32
    w2: jax.Array       # (HIDDEN, HIDDEN) MXU_DTYPE
    b2: jax.Array       # (1, HIDDEN) f32
    w3: jax.Array       # (HIDDEN, LANE) MXU_DTYPE, lane-padded
    b3: jax.Array       # (1, LANE) f32, lane-padded
    n_states: int
    n_actions: int


def prepare_params(params):
    """One-time padding / dtype cast. Call once at init; reuse every forward."""
    w1, b1, w2, b2, w3, b3 = params        # torch-equivalent, weights stored (in, out)
    n_states = w1.shape[0]
    n_actions = w3.shape[1]
    w1_p = jnp.pad(w1.astype(jnp.float32), ((0, FEAT_PAD - n_states), (0, 0)))
    w3_p = jnp.pad(w3.astype(MXU_DTYPE), ((0, 0), (0, LANE - n_actions)))
    b3_p = jnp.pad(b3.astype(jnp.float32), ((0, 0), (0, LANE - n_actions)))
    return PreparedParams(
        w1=w1_p, b1=b1.astype(jnp.float32),
        w2=w2.astype(MXU_DTYPE), b2=b2.astype(jnp.float32),
        w3=w3_p, b3=b3_p,
        n_states=n_states, n_actions=n_actions)


def dqn_kernel(x_ref, w1_ref, b1_ref, w2_ref, b2_ref, w3_ref, b3_ref, o_ref):
    # ---- fc1 + ReLU: tiny-K (tm,8)x(8,128) matmul on the otherwise-idle MXU ----
    h1 = jnp.dot(x_ref[...], w1_ref[...],
                 preferred_element_type=jnp.float32) + b1_ref[...]
    h1 = jnp.maximum(h1, 0.0)

    # ---- fc2 + ReLU: 128x128 MXU matmul, bf16 operands, f32 accumulate --------
    h2 = jnp.dot(h1.astype(w2_ref.dtype), w2_ref[...],
                 preferred_element_type=jnp.float32) + b2_ref[...]
    h2 = jnp.maximum(h2, 0.0)

    # ---- fc3: lane-dense 128-wide output (w3/b3 zero-padded), unmasked vst ----
    out = jnp.dot(h2.astype(w3_ref.dtype), w3_ref[...],
                  preferred_element_type=jnp.float32) + b3_ref[...]
    o_ref[...] = out.astype(o_ref.dtype)


def dqn_forward(x, prepared: PreparedParams, *, tm_max=512):
    """Fused DQN forward. x: (B, n_states) f32 -> (B, n_actions) f32 Q-values."""
    B, n_states = x.shape
    assert n_states == prepared.n_states

    tm, b_pad, n_tiles = _select_tile(B, tm_max)

    # Single pad op: batch rows up to the grid, features up to one sublane.
    x_p = jnp.pad(x.astype(jnp.float32),
                  ((0, b_pad - B), (0, FEAT_PAD - n_states)))

    out_padded = pl.pallas_call(
        dqn_kernel,
        out_shape=jax.ShapeDtypeStruct((b_pad, LANE), jnp.float32),
        grid_spec=pltpu.PrefetchScalarGridSpec(
            num_scalar_prefetch=0,
            grid=(n_tiles,),
            in_specs=[
                pl.BlockSpec((tm, FEAT_PAD), lambda i: (i, 0)),       # x: tiled over batch
                pl.BlockSpec((FEAT_PAD, HIDDEN), lambda i: (0, 0)),   # weights stay resident
                pl.BlockSpec((1, HIDDEN), lambda i: (0, 0)),
                pl.BlockSpec((HIDDEN, HIDDEN), lambda i: (0, 0)),
                pl.BlockSpec((1, HIDDEN), lambda i: (0, 0)),
                pl.BlockSpec((HIDDEN, LANE), lambda i: (0, 0)),
                pl.BlockSpec((1, LANE), lambda i: (0, 0)),
            ],
            out_specs=pl.BlockSpec((tm, LANE), lambda i: (i, 0)),
        ),
        compiler_params=pltpu.CompilerParams(
            dimension_semantics=("parallel",)),   # batch tiles across TCs on v7x
    )(x_p, prepared.w1, prepared.b1, prepared.w2, prepared.b2,
      prepared.w3, prepared.b3)

    return out_padded[:B, :prepared.n_actions]


def init_params(key, n_states, n_actions, hidden=HIDDEN):
    # Deterministic init mimicking torch.nn.Linear default:
    # U(-1/sqrt(fan_in), 1/sqrt(fan_in)). Weights stored as (in, out).
    ks = jax.random.split(key, 6)

    def lin(kw, kb, fan_in, fan_out):
        bound = 1.0 / jnp.sqrt(jnp.float32(fan_in))
        w = jax.random.uniform(kw, (fan_in, fan_out), jnp.float32, -bound, bound)
        b = jax.random.uniform(kb, (1, fan_out), jnp.float32, -bound, bound)
        return w, b

    w1, b1 = lin(ks[0], ks[1], n_states, hidden)
    w2, b2 = lin(ks[2], ks[3], hidden, hidden)
    w3, b3 = lin(ks[4], ks[5], hidden, n_actions)
    return (w1, b1, w2, b2, w3, b3)


def dqn_reference(x, params):
    w1, b1, w2, b2, w3, b3 = params
    h1 = jnp.maximum(x @ w1 + b1, 0.0)
    h2 = jnp.maximum(h1 @ w2 + b2, 0.0)
    return h2 @ w3 + b3


if __name__ == "__main__":
    # CartPole-v0: n_states = 4, n_actions = 2
    n_states, n_actions = 4, 2

    key = jax.random.PRNGKey(0)
    k_x, k_p, k_x2 = jax.random.split(key, 3)
    params = init_params(k_p, n_states, n_actions)
    prepared = prepare_params(params)   # one-time padding/cast, out of the call path

    # bf16 MXU operands (f32 accumulation) need a looser tolerance vs. the f32 ref.
    tol = dict(atol=5e-2, rtol=5e-2) if MXU_DTYPE == jnp.bfloat16 \
        else dict(atol=1e-5, rtol=1e-5)

    # Small acting-path batch: single 8-row tile.
    x = jax.random.normal(k_x, (8, n_states), dtype=jnp.float32)
    out = jax.block_until_ready(dqn_forward(x, prepared))
    ref = dqn_reference(x, params)
    assert out.shape == (8, n_actions)
    assert jnp.allclose(out, ref, **tol)

    # Replay-sized, non-multiple batch: tile-count-first selection -> 2 tiles of 152.
    x2 = jax.random.normal(k_x2, (300, n_states), dtype=jnp.float32)
    out2 = jax.block_until_ready(dqn_forward(x2, prepared))
    ref2 = dqn_reference(x2, params)
    assert out2.shape == (300, n_actions)
    assert jnp.allclose(out2, ref2, **tol)

    print("KERNEL_OK")
</pallas_src>

<mosaic_0001>
module attributes {stable_mosaic.version = 11 : i64} {
  func.func @dqn_kernel(%arg0: i32, %arg1: memref<8x8xf32, #tpu.memory_space<vmem>>, %arg2: memref<8x128xf32, #tpu.memory_space<vmem>>, %arg3: memref<1x128xf32, #tpu.memory_space<vmem>>, %arg4: memref<128x128xbf16, #tpu.memory_space<vmem>>, %arg5: memref<1x128xf32, #tpu.memory_space<vmem>>, %arg6: memref<128x128xbf16, #tpu.memory_space<vmem>>, %arg7: memref<1x128xf32, #tpu.memory_space<vmem>>, %arg8: memref<8x128xf32, #tpu.memory_space<vmem>>) attributes {dimension_semantics = [#tpu.dimension_semantics<parallel>], iteration_bounds = array<i64: 1>, scalar_prefetch = 0 : i64, scratch_operands = 0 : i64, tpu.core_type = #tpu.core_type<tc>, window_params = [{transform_indices = @transform_0, window_bounds = array<i64: 8, 8>}, {pipeline_mode = #tpu.pipeline_mode<synchronous>, transform_indices = @transform_1, window_bounds = array<i64: 8, 128>}, {pipeline_mode = #tpu.pipeline_mode<synchronous>, transform_indices = @transform_2, window_bounds = array<i64: 1, 128>}, {pipeline_mode = #tpu.pipeline_mode<synchronous>, transform_indices = @transform_3, window_bounds = array<i64: 128, 128>}, {pipeline_mode = #tpu.pipeline_mode<synchronous>, transform_indices = @transform_4, window_bounds = array<i64: 1, 128>}, {pipeline_mode = #tpu.pipeline_mode<synchronous>, transform_indices = @transform_5, window_bounds = array<i64: 128, 128>}, {pipeline_mode = #tpu.pipeline_mode<synchronous>, transform_indices = @transform_6, window_bounds = array<i64: 1, 128>}, {transform_indices = @transform_7, window_bounds = array<i64: 8, 128>}]} {
    %c0 = arith.constant 0 : index
    %c0_0 = arith.constant 0 : index
    %0 = vector.load %arg1[%c0, %c0_0] : memref<8x8xf32, #tpu.memory_space<vmem>>, vector<8x8xf32>
    %c0_1 = arith.constant 0 : index
    %c0_2 = arith.constant 0 : index
    %1 = vector.load %arg2[%c0_1, %c0_2] : memref<8x128xf32, #tpu.memory_space<vmem>>, vector<8x128xf32>
    %cst = arith.constant dense<0.000000e+00> : vector<8x128xf32>
    %2 = tpu.matmul %0, %1, %cst {dimension_numbers = #tpu.dot_dimension_numbers<[1], [0], [0], [1], [0, 0, 1, 1], [], []>} : vector<8x8xf32>, vector<8x128xf32>, vector<8x128xf32> -> vector<8x128xf32>
    %c0_3 = arith.constant 0 : index
    %c0_4 = arith.constant 0 : index
    %3 = vector.load %arg3[%c0_3, %c0_4] : memref<1x128xf32, #tpu.memory_space<vmem>>, vector<1x128xf32>
    %4 = vector.broadcast %3 : vector<1x128xf32> to vector<8x128xf32>
    %5 = arith.addf %2, %4 : vector<8x128xf32>
    %cst_5 = arith.constant 0.000000e+00 : f32
    %6 = vector.broadcast %cst_5 : f32 to vector<8x128xf32>
    %7 = arith.maximumf %5, %6 : vector<8x128xf32>
    %8 = arith.truncf %7 : vector<8x128xf32> to vector<8x128xbf16>
    %c0_6 = arith.constant 0 : index
    %c0_7 = arith.constant 0 : index
    %9 = vector.load %arg4[%c0_6, %c0_7] : memref<128x128xbf16, #tpu.memory_space<vmem>>, vector<128x128xbf16>
    %cst_8 = arith.constant dense<0.000000e+00> : vector<8x128xf32>
    %10 = tpu.matmul %8, %9, %cst_8 {dimension_numbers = #tpu.dot_dimension_numbers<[1], [0], [0], [1], [0, 0, 1, 1], [], []>} : vector<8x128xbf16>, vector<128x128xbf16>, vector<8x128xf32> -> vector<8x128xf32>
    %c0_9 = arith.constant 0 : index
    %c0_10 = arith.constant 0 : index
    %11 = vector.load %arg5[%c0_9, %c0_10] : memref<1x128xf32, #tpu.memory_space<vmem>>, vector<1x128xf32>
    %12 = vector.broadcast %11 : vector<1x128xf32> to vector<8x128xf32>
    %13 = arith.addf %10, %12 : vector<8x128xf32>
    %cst_11 = arith.constant 0.000000e+00 : f32
    %14 = vector.broadcast %cst_11 : f32 to vector<8x128xf32>
    %15 = arith.maximumf %13, %14 : vector<8x128xf32>
    %16 = arith.truncf %15 : vector<8x128xf32> to vector<8x128xbf16>
    %c0_12 = arith.constant 0 : index
    %c0_13 = arith.constant 0 : index
    %17 = vector.load %arg6[%c0_12, %c0_13] : memref<128x128xbf16, #tpu.memory_space<vmem>>, vector<128x128xbf16>
    %cst_14 = arith.constant dense<0.000000e+00> : vector<8x128xf32>
    %18 = tpu.matmul %16, %17, %cst_14 {dimension_numbers = #tpu.dot_dimension_numbers<[1], [0], [0], [1], [0, 0, 1, 1], [], []>} : vector<8x128xbf16>, vector<128x128xbf16>, vector<8x128xf32> -> vector<8x128xf32>
    %c0_15 = arith.constant 0 : index
    %c0_16 = arith.constant 0 : index
    %19 = vector.load %arg7[%c0_15, %c0_16] : memref<1x128xf32, #tpu.memory_space<vmem>>, vector<1x128xf32>
    %20 = vector.broadcast %19 : vector<1x128xf32> to vector<8x128xf32>
    %21 = arith.addf %18, %20 : vector<8x128xf32>
    %c0_17 = arith.constant 0 : index
    %c0_18 = arith.constant 0 : index
    %22 = vector.load %arg8[%c0_17, %c0_18] : memref<8x128xf32, #tpu.memory_space<vmem>>, vector<8x128xf32>
    tpu.vector_store %arg8[%c0_17, %c0_18], %21 {strides = array<i32>} : memref<8x128xf32, #tpu.memory_space<vmem>>, vector<8x128xf32>,
    return
  }
  func.func @transform_0(%arg0: i32) -> (i32, i32) {
    %c0_i32 = arith.constant 0 : i32
    %c0_i32_0 = arith.constant 0 : i32
    return %arg0, %c0_i32 : i32, i32
  }
  func.func @transform_1(%arg0: i32) -> (i32, i32) {
    %c0_i32 = arith.constant 0 : i32
    %c0_i32_0 = arith.constant 0 : i32
    %c0_i32_1 = arith.constant 0 : i32
    return %c0_i32, %c0_i32_0 : i32, i32
  }
  func.func @transform_2(%arg0: i32) -> (i32, i32) {
    %c0_i32 = arith.constant 0 : i32
    %c0_i32_0 = arith.constant 0 : i32
    %c0_i32_1 = arith.constant 0 : i32
    return %c0_i32, %c0_i32_0 : i32, i32
  }
  func.func @transform_3(%arg0: i32) -> (i32, i32) {
    %c0_i32 = arith.constant 0 : i32
    %c0_i32_0 = arith.constant 0 : i32
    %c0_i32_1 = arith.constant 0 : i32
    return %c0_i32, %c0_i32_0 : i32, i32
  }
  func.func @transform_4(%arg0: i32) -> (i32, i32) {
    %c0_i32 = arith.constant 0 : i32
    %c0_i32_0 = arith.constant 0 : i32
    %c0_i32_1 = arith.constant 0 : i32
    return %c0_i32, %c0_i32_0 : i32, i32
  }
  func.func @transform_5(%arg0: i32) -> (i32, i32) {
    %c0_i32 = arith.constant 0 : i32
    %c0_i32_0 = arith.constant 0 : i32
    %c0_i32_1 = arith.constant 0 : i32
    return %c0_i32, %c0_i32_0 : i32, i32
  }
  func.func @transform_6(%arg0: i32) -> (i32, i32) {
    %c0_i32 = arith.constant 0 : i32
    %c0_i32_0 = arith.constant 0 : i32
    %c0_i32_1 = arith.constant 0 : i32
    return %c0_i32, %c0_i32_0 : i32, i32
  }
  func.func @transform_7(%arg0: i32) -> (i32, i32) {
    %c0_i32 = arith.constant 0 : i32
    %c0_i32_0 = arith.constant 0 : i32
    return %arg0, %c0_i32 : i32, i32
  }
}

</mosaic_0001>

<bundles_post_ra>
// kernel: tpu_custom_call.1
= control target key start
LH: loop header
LB: loop body
LE: loop exit
PB: predicated region body
PF: predicated region fallthrough
CT: control target
= control target key end

     0   :  { %12 = vsyncpa [#allocation3], 0  ;;  %s592_s0 = inlined_call_operand.hbm [shape: f32[8,8], index: 0, kind: input, shape index: {}]   ;;  %s593_s1 = inlined_call_operand.hbm [shape: f32[8,128], index: 1, kind: input, shape index: {}]   ;;  %s594_s2 = inlined_call_operand.vmem [shape: f32[1,128], index: 2, kind: input, shape index: {}]   ;;  %s595_s3 = inlined_call_operand.hbm [shape: bf16[128,128], index: 3, kind: input, shape index: {}]   ;;  %s596_s4 = inlined_call_operand.vmem [shape: f32[1,128], index: 4, kind: input, shape index: {}]   ;;  %s597_s5 = inlined_call_operand.hbm [shape: bf16[128,128], index: 5, kind: input, shape index: {}]   ;;  %s598_s6 = inlined_call_operand.vmem [shape: f32[1,128], index: 6, kind: input, shape index: {}]   ;;  %s599_s7 = inlined_call_operand.hbm [shape: f32[8,128], index: 7, kind: output, shape index: {}]  }
   0x1   :  { %13 = vsyncpa [#allocation6], 0 }
   0x2   :  { %14 = vsyncpa [#allocation9], 0  ;;  %s32_s26 = sshll.u32 %s593_s1, 4  ;;  %s33_s26 = int_to_ptr.hbm [resolvable:$true] %s32_s26 }
   0x3   :  { %15 = vsyncpa [#allocation4], 0  ;;  %s521_s27 = smov [#allocation5]   ;;  %s21_s8 = sshll.u32 %s592_s0, 4  ;;  %s22_s8 = int_to_ptr.hbm [resolvable:$true] %s21_s8 }
   0x4   :  { %s34_s28 = sshll.u32 %s521_s27, 4  ;;  %s522_s9 = smov [#allocation2]   ;;  %s35_s28 = int_to_ptr.vmem [resolvable:$true] %s34_s28 }
   0x5   :  { %37 = dma.hbm_to_vmem [thread:$0]  %s33_s26, 128, %s35_s28, [#allocation6]  }
   0x6   :  { %s23_s10 = sshll.u32 %s522_s9, 4  ;;  %s44_s13 = sshll.u32 %s595_s3, 4  ;;  %s24_s10 = int_to_ptr.vmem [resolvable:$true] %s23_s10  ;;  %s45_s13 = int_to_ptr.hbm [resolvable:$true] %s44_s13 }
   0x7   :  { %26 = dma.hbm_to_vmem [thread:$0]  %s22_s8, 128, %s24_s10, [#allocation3]  }
   0x8   :  { %s523_s1 = smov [#allocation7]   ;;  %s59_s17 = sshll.u32 %s597_s5, 4  ;;  %s60_s17 = int_to_ptr.hbm [resolvable:$true] %s59_s17 }
   0x9   :  { %s46_s14 = sshll.u32 %s523_s1, 4  ;;  %s524_s18 = smov 64   ;;  %s47_s14 = int_to_ptr.vmem [resolvable:$true] %s46_s14 }
   0xa   :  { %s525_s0 = smov 4   ;;  %s526_s19 = smov [#allocation8]  }
   0xb   :  { %52 = dma.hbm_to_vmem [thread:$0]  %s45_s13, 1024, %s47_s14, [#allocation6], %s524_s18, %s524_s18, %s525_s0  }
   0xc   :  { %s61_s20 = sshll.u32 %s526_s19, 4  ;;  %s62_s20 = int_to_ptr.vmem [resolvable:$true] %s61_s20 }
   0xd   :  { %67 = dma.hbm_to_vmem [thread:$0]  %s60_s17, 1024, %s62_s20, [#allocation9], %s524_s18, %s524_s18, %s525_s0  }
   0xe   :  { %513 = dma.done.wait [#allocation3], 128  }
   0xf   :  { %514 = vsyncadd [#allocation3], 4294967168 }
  0x10   :  { %515 = dma.done.wait [#allocation6], 1152  }
  0x11   :  { %516 = vsyncadd [#allocation6], 4294966144 }
  0x12   :  { %517 = dma.done.wait [#allocation9], 1024  }
  0x13   :  { %518 = vsyncadd [#allocation9], 4294966272  ;;  %vm92_vm0 = vcmask 64512   ;;  %v87_v0 = vld [vmem:[#allocation5] sm:$0xff]  ;;  %v86_v1 = vld [vmem:[#allocation2] sm:$0xff]  ;;  %s527_s24 = smov [#allocation10]  }
  0x14   :  { %v374_v2 = vld [vmem:[#allocation7 + $0x38] sm:$0xff]  ;;  %111 = vmatpush.msra.mxu0 %v87_v0  ;;  %v373_v3 = vld [vmem:[#allocation7 + $0x30] sm:$0xff]  ;;  %v372_v4 = vld [vmem:[#allocation7 + $0x28] sm:$0xff]  ;;  %s288_s25 = sshll.u32 %s527_s24, 4  ;;  %s290_s28 = sshll.u32 %s599_s7, 4  ;;  %s289_s25 = int_to_ptr.vmem [resolvable:$true] %s288_s25  ;;  %s291_s28 = int_to_ptr.hbm [resolvable:$true] %s290_s28 }
  0x15   :  { %302 = vmatmul.msk.f32.vlgmr.msra.gmra.mxu0 %vm92_vm0, %v86_v1  ;;  %186 = vmatpush.bf16.msra.mxu1 %v374_v2  ;;  %v371_v5 = vld [vmem:[#allocation7 + $0x20] sm:$0xff]  ;;  %v370_v6 = vld [vmem:[#allocation7 + $0x18] sm:$0xff]  ;;  %v369_v7 = vld [vmem:[#allocation7 + $0x10] sm:$0xff] }
  0x16   :  { %v368_v8 = vld [vmem:[#allocation7 + $0x8] sm:$0xff]  ;;  %v367_v9 = vld [vmem:[#allocation7] sm:$0xff]  ;;  %v382_v10 = vld [vmem:[#allocation8 + $0x38] sm:$0xff] }
  0x17   :  { %269 = vmatpush.bf16.msra.mxu2 %v382_v10  ;;  %v381_v11 = vld [vmem:[#allocation8 + $0x30] sm:$0xff]  ;;  %v380_v12 = vld [vmem:[#allocation8 + $0x28] sm:$0xff]  ;;  %v379_v13 = vld [vmem:[#allocation8 + $0x20] sm:$0xff] }
  0x18   :  { %v378_v14 = vld [vmem:[#allocation8 + $0x18] sm:$0xff]  ;;  %v377_v15 = vld [vmem:[#allocation8 + $0x10] sm:$0xff]  ;;  %v376_v21 = vld [vmem:[#allocation8 + $0x8] sm:$0xff] }
  0x19   :  { %187 = vmatpush.bf16.msra.mxu1 %v373_v3  ;;  %v390_v16 = vld [vmem:[%s594_s2] ss:$0 sm:$0xff]  ;;  %v375_v22 = vld [vmem:[#allocation8] sm:$0xff] }
  0x1a   :  { %v391_v23 = vld [vmem:[%s596_s4] ss:$0 sm:$0xff] }
  0x1b   :  { %270 = vmatpush.bf16.msra.mxu2 %v381_v11  ;;  %v392_v29 = vld [vmem:[%s598_s6] ss:$0 sm:$0xff] }
  0x1d   :  { %188 = vmatpush.bf16.msra.mxu1 %v372_v4 }
  0x1f   :  { %271 = vmatpush.bf16.msra.mxu2 %v380_v12 }
  0x21   :  { %189 = vmatpush.bf16.msra.mxu1 %v371_v5 }
  0x23   :  { %272 = vmatpush.bf16.msra.mxu2 %v379_v13 }
  0x25   :  { %190 = vmatpush.bf16.msra.mxu1 %v370_v6 }
  0x27   :  { %273 = vmatpush.bf16.msra.mxu2 %v378_v14 }
  0x29   :  { %191 = vmatpush.bf16.msra.mxu1 %v369_v7 }
  0x2b   :  { %274 = vmatpush.bf16.msra.mxu2 %v377_v15 }
  0x2d   :  { %192 = vmatpush.bf16.msra.mxu1 %v368_v8 }
  0x2f   :  { %275 = vmatpush.bf16.msra.mxu2 %v376_v21 }
  0x31   :  { %193 = vmatpush.bf16.msra.mxu1 %v367_v9 }
  0x33   :  { %276 = vmatpush.bf16.msra.mxu2 %v375_v22 }
  0x92   :  { %v113_v17 = vpop.f32.mrf.mxu0 }
  0x93   :  { %v114_v18 = vadd.f32 %v390_v16, %v113_v17 }
  0x95   :  { %v116_v19 = vmax.f32 %v114_v18, 0.0 }
  0x97   :  { %v117_v20 = vpack.c.bf16 %v116_v19, %v116_v19 }
  0x99   :  { %194 = vmatmul.bf16.vlgmr.msra.gmra.mxu1 %v117_v20 }
 0x116   :  { %v195_v24 = vpop.f32.mrf.mxu1 }
 0x117   :  { %v196_v25 = vadd.f32 %v391_v23, %v195_v24 }
 0x119   :  { %v199_v26 = vmax.f32 %v196_v25, 0.0 }
 0x11b   :  { %v200_v27 = vpack.c.bf16 %v199_v26, %v199_v26 }
 0x11d   :  { %277 = vmatmul.bf16.vlgmr.msra.gmra.mxu2 %v200_v27 }
 0x11e   :  { %v197_v28 = vpop.f32.mrf.mxu1 }
 0x1a0   :  { %v278_v30 = vpop.f32.mrf.mxu2 }
 0x1a1   :  { %v279_v31 = vadd.f32 %v392_v29, %v278_v30 }
 0x1a3   :  { %282 = vst [vmem:[#allocation10] sm:$0xff] %v279_v31 }
 0x1a4   :  { %293 = dma.vmem_to_hbm [thread:$0]  %s289_s25, 128, %s291_s28, [#allocation4]  }
 0x1a8   :  { %v280_v32 = vpop.f32.mrf.mxu2 }
 0x1a9   :  { %519 = dma.done.wait [#allocation4], 128  }
 0x1aa   :  { %520 = vsyncadd [#allocation4], 4294967168 }
 0x1ab   :  { %298 = vsyncpa [#allocation3], 1 }
 0x1ac   :  { %299 = vsyncpa [#allocation6], 1 }
 0x1ad   :  { %300 = vsyncpa [#allocation9], 1 }
 0x1ae   :  { %301 = vsyncpa [#allocation4], 1 }

</bundles_post_ra>
